<compile_context>
chip_gen: v6e
topology: v6e:2x2x1
jax: 0.10.0
libtpu: 0.0.40
codegen_flags: <defaults>
</compile_context>

<pallas_src>
import functools

import jax
import jax.numpy as jnp
from jax.experimental import pallas as pl
from jax.experimental.pallas import tpu as pltpu


def _round_up(v, m):
    return -(-v // m) * m


def _conv_bn_relu_kernel(*refs, kh, kw, wp, has_halo):
    """One (batch, row-tile) grid step.

    refs (has_halo=True):  x_cur, x_next, w, sb, out
    refs (has_halo=False): x_cur,         w, sb, out

    x_cur / x_next: (1, Cin, tm)        consecutive row tiles of the flattened,
                                        zero-padded channels-first input
    w:              (KH*KW, Cout, Cin)  one (Cout, Cin) tap per leading index
    sb:             (Cout, 2)           folded [scale | bias] (f32)
    out:            (1, Cout, tm)       lane-dense output tile
    """
    if has_halo:
        x_cur_ref, x_nxt_ref, w_ref, sb_ref, o_ref = refs
        window = jnp.concatenate([x_cur_ref[0], x_nxt_ref[0]], axis=-1)  # (Cin, 2*tm)
    else:
        x_cur_ref, w_ref, sb_ref, o_ref = refs
        window = x_cur_ref[0]                                            # (Cin, tm)

    cout = o_ref.shape[1]
    tm = o_ref.shape[2]

    acc = jnp.zeros((cout, tm), jnp.float32)
    for i in range(kh):
        for j in range(kw):
            s = i * wp + j                       # static tap shift (rows)
            patch = window[:, s:s + tm]          # (Cin, tm), static lane slice
            w_tap = w_ref[i * kw + j]            # (Cout, Cin)
            acc = acc + jnp.dot(w_tap, patch, preferred_element_type=jnp.float32)

    scale = sb_ref[:, 0:1]                       # (Cout, 1) f32
    bias = sb_ref[:, 1:2]                        # (Cout, 1) f32
    out = jnp.maximum(acc * scale + bias, 0.0)
    o_ref[0] = out.astype(o_ref.dtype)


def basic_conv2d(x, conv_w, conv_b, bn_gamma, bn_beta, bn_mean, bn_var, *,
                 stride=1, padding=0, eps=1e-3,
                 compute_dtype=jnp.bfloat16, tile_rows=512):
    """Forward of BasicConv2d: ReLU(BatchNorm2d(Conv2d(x))), eval-mode BN.

    x:       (B, Cin, H, W)       NCHW (PyTorch layout)
    conv_w:  (Cout, Cin, KH, KW)  PyTorch Conv2d weight layout
    conv_b:  (Cout,) or None
    bn_*:    (Cout,)              BatchNorm2d affine params / running stats
    """
    assert stride == 1, "TODO(synk): stride != 1 not implemented"
    assert isinstance(padding, int), "TODO(synk): only symmetric int padding"

    b, cin, h, w = x.shape
    cout, cin_w, kh, kw = conv_w.shape
    assert cin == cin_w, "TODO(synk): grouped conv not implemented"

    hp, wp = h + 2 * padding, w + 2 * padding
    h_out = hp - kh + 1
    w_out = wp - kw + 1
    assert h_out > 0 and w_out > 0

    # Output rows in the flattened (h, wp) space: wp columns per image row,
    # the last (kw - 1) of which are garbage and dropped in the wrapper.
    n_rows_out = h_out * wp
    halo = (kh - 1) * wp + (kw - 1)

    # Row-tile size: multiple of 128 (lane-dense), >= halo (so tile t and t+1
    # always cover every tap window), capped so the f32 accumulator stays small
    # even for large Cout.
    tm = min(tile_rows, _round_up(n_rows_out, 128))
    tm = min(tm, max(256, _round_up(131072 // max(cout, 1), 128)))
    tm = max(tm, _round_up(max(halo, 1), 128), 128)

    num_tiles = -(-n_rows_out // tm)
    r_out = num_tiles * tm
    has_halo = halo > 0
    r_in = (num_tiles + (1 if has_halo else 0)) * tm

    # Channels-first flattened, zero-padded input (no NCHW<->NHWC transpose).
    x_pad = jnp.pad(x, ((0, 0), (0, 0), (padding, padding), (padding, padding)))
    x_flat = x_pad.reshape(b, cin, hp * wp)
    x_flat = jnp.pad(x_flat, ((0, 0), (0, 0), (0, r_in - hp * wp)))
    x_flat = x_flat.astype(compute_dtype)

    # Weight as (KH*KW, Cout, Cin) taps; fold conv bias + BN into scale/bias.
    w_taps = jnp.transpose(conv_w, (2, 3, 0, 1)).reshape(kh * kw, cout, cin)
    w_taps = w_taps.astype(compute_dtype)
    scale = (bn_gamma / jnp.sqrt(bn_var + eps)).astype(jnp.float32)
    if conv_b is None:
        conv_b = jnp.zeros((cout,), jnp.float32)
    bias = (bn_beta + scale * (conv_b - bn_mean)).astype(jnp.float32)
    sb = jnp.stack([scale, bias], axis=-1)                    # (Cout, 2) f32

    # VMEM budget derived from the actual (sublane, lane)-padded block sizes,
    # with 2x headroom, clamped to 48 MiB (safe on v7x's 64 MiB physical VMEM).
    in_item = jnp.dtype(compute_dtype).itemsize
    out_item = jnp.dtype(x.dtype).itemsize

    def _tile_bytes(sub, lane, item):
        return _round_up(sub, 32 // item) * _round_up(lane, 128) * item

    needed = ((2 if has_halo else 1) * 2 * _tile_bytes(cin, tm, in_item)
              + 2 * _tile_bytes(cout, tm, out_item)
              + 2 * kh * kw * _tile_bytes(cout, cin, in_item)
              + 2 * _tile_bytes(cout, 2, 4))
    vmem_limit = int(min(48 * 2**20, max(16 * 2**20, 2 * needed)))

    kernel = functools.partial(_conv_bn_relu_kernel,
                               kh=kh, kw=kw, wp=wp, has_halo=has_halo)

    in_specs = [pl.BlockSpec((1, cin, tm), lambda bb, t: (bb, 0, t))]
    if has_halo:
        in_specs.append(pl.BlockSpec((1, cin, tm), lambda bb, t: (bb, 0, t + 1)))
    in_specs += [
        pl.BlockSpec((kh * kw, cout, cin), lambda bb, t: (0, 0, 0)),   # resident
        pl.BlockSpec((cout, 2), lambda bb, t: (0, 0)),                 # resident
    ]
    x_args = (x_flat, x_flat) if has_halo else (x_flat,)

    out = pl.pallas_call(
        kernel,
        out_shape=jax.ShapeDtypeStruct((b, cout, r_out), x.dtype),
        grid_spec=pltpu.PrefetchScalarGridSpec(
            num_scalar_prefetch=0,
            grid=(b, num_tiles),
            in_specs=in_specs,
            out_specs=pl.BlockSpec((1, cout, tm), lambda bb, t: (bb, 0, t)),
        ),
        compiler_params=pltpu.CompilerParams(
            dimension_semantics=("parallel", "parallel"),
            vmem_limit_bytes=vmem_limit,
        ),
    )(*x_args, w_taps, sb)

    # Drop tile-padding rows and the (wp - w_out) garbage columns; the result
    # is already NCHW, so no output transpose is needed.
    out = out[:, :, :n_rows_out].reshape(b, cout, h_out, wp)[:, :, :, :w_out]
    return out


def basic_conv2d_ref(x, conv_w, conv_b, bn_gamma, bn_beta, bn_mean, bn_var, *,
                     padding=0, eps=1e-3):
    """Pure-JAX reference mirroring the PyTorch module (eval-mode BN)."""
    y = jax.lax.conv_general_dilated(
        x, conv_w, window_strides=(1, 1),
        padding=((padding, padding), (padding, padding)),
        dimension_numbers=("NCHW", "OIHW", "NCHW"))
    if conv_b is not None:
        y = y + conv_b[None, :, None, None]
    scale = bn_gamma / jnp.sqrt(bn_var + eps)
    y = (y - bn_mean[None, :, None, None]) * scale[None, :, None, None] \
        + bn_beta[None, :, None, None]
    return jnp.maximum(y, 0.0)


if __name__ == "__main__":
    key = jax.random.PRNGKey(0)
    k_x, k_w, k_b, k_g, k_be, k_m, k_v = jax.random.split(key, 7)

    # Shapes consistent with BasicConv2d(in=4, out=32, kernel=3, padding=1).
    B, Cin, H, W = 2, 4, 16, 16
    Cout, K, pad = 32, 3, 1

    x = jax.random.normal(k_x, (B, Cin, H, W), dtype=jnp.float32)
    conv_w = jax.random.normal(k_w, (Cout, Cin, K, K), dtype=jnp.float32) * 0.1
    conv_b = jax.random.normal(k_b, (Cout,), dtype=jnp.float32) * 0.1
    bn_gamma = 1.0 + 0.1 * jax.random.normal(k_g, (Cout,), dtype=jnp.float32)
    bn_beta = 0.1 * jax.random.normal(k_be, (Cout,), dtype=jnp.float32)
    bn_mean = 0.1 * jax.random.normal(k_m, (Cout,), dtype=jnp.float32)
    bn_var = jax.random.uniform(k_v, (Cout,), dtype=jnp.float32,
                                minval=0.5, maxval=1.5)

    ref = basic_conv2d_ref(x, conv_w, conv_b, bn_gamma, bn_beta, bn_mean,
                           bn_var, padding=pad, eps=1e-3)

    # Exact-semantics path (f32 operands) -> tight tolerance.
    out_f32 = jax.block_until_ready(basic_conv2d(
        x, conv_w, conv_b, bn_gamma, bn_beta, bn_mean, bn_var,
        padding=pad, eps=1e-3, compute_dtype=jnp.float32))
    assert out_f32.shape == (B, Cout, H, W), out_f32.shape
    err_f32 = float(jnp.max(jnp.abs(out_f32 - ref)))
    assert err_f32 < 1e-4, err_f32

    # Default fast path (bf16 operands, f32 accumulation) -> bf16 tolerance.
    out_bf16 = jax.block_until_ready(basic_conv2d(
        x, conv_w, conv_b, bn_gamma, bn_beta, bn_mean, bn_var,
        padding=pad, eps=1e-3))
    assert out_bf16.shape == (B, Cout, H, W), out_bf16.shape
    err_bf16 = float(jnp.max(jnp.abs(out_bf16 - ref)))
    assert err_bf16 < 5e-2, err_bf16

    print("KERNEL_OK")
</pallas_src>

<mosaic_0001>
module attributes {stable_mosaic.version = 11 : i64} {
  func.func @_conv_bn_relu_kernel(%arg0: i32, %arg1: i32, %arg2: memref<1x4x384xf32, #tpu.memory_space<vmem>>, %arg3: memref<1x4x384xf32, #tpu.memory_space<vmem>>, %arg4: memref<9x32x4xf32, #tpu.memory_space<vmem>>, %arg5: memref<32x2xf32, #tpu.memory_space<vmem>>, %arg6: memref<1x32x384xf32, #tpu.memory_space<vmem>>) attributes {dimension_semantics = [#tpu.dimension_semantics<parallel>, #tpu.dimension_semantics<parallel>], iteration_bounds = array<i64: 2, 1>, scalar_prefetch = 0 : i64, scratch_operands = 0 : i64, tpu.core_type = #tpu.core_type<tc>, window_params = [{transform_indices = @transform_0, window_bounds = array<i64: 1, 4, 384>}, {transform_indices = @transform_1, window_bounds = array<i64: 1, 4, 384>}, {pipeline_mode = #tpu.pipeline_mode<synchronous>, transform_indices = @transform_2, window_bounds = array<i64: 9, 32, 4>}, {pipeline_mode = #tpu.pipeline_mode<synchronous>, transform_indices = @transform_3, window_bounds = array<i64: 32, 2>}, {transform_indices = @transform_4, window_bounds = array<i64: 1, 32, 384>}]} {
    %c0 = arith.constant 0 : index
    %c0_0 = arith.constant 0 : index
    %c0_1 = arith.constant 0 : index
    %0 = vector.load %arg2[%c0, %c0_0, %c0_1] : memref<1x4x384xf32, #tpu.memory_space<vmem>>, vector<1x4x384xf32>
    %1 = vector.shape_cast %0 : vector<1x4x384xf32> to vector<4x384xf32>
    %c0_2 = arith.constant 0 : index
    %c0_3 = arith.constant 0 : index
    %c0_4 = arith.constant 0 : index
    %2 = vector.load %arg3[%c0_2, %c0_3, %c0_4] : memref<1x4x384xf32, #tpu.memory_space<vmem>>, vector<1x4x384xf32>
    %3 = vector.shape_cast %2 : vector<1x4x384xf32> to vector<4x384xf32>
    %4 = tpu.concatenate %1, %3 in 1 : vector<4x384xf32>, vector<4x384xf32> -> vector<4x768xf32>
    %cst = arith.constant 0.000000e+00 : f32
    %5 = vector.broadcast %cst : f32 to vector<32x384xf32>
    %6 = vector.extract_strided_slice %4 {offsets = [0, 0], sizes = [4, 384], strides = [1, 1]} : vector<4x768xf32> to vector<4x384xf32>
    %c0_5 = arith.constant 0 : index
    %c0_6 = arith.constant 0 : index
    %c0_7 = arith.constant 0 : index
    %7 = vector.load %arg4[%c0_5, %c0_6, %c0_7] : memref<9x32x4xf32, #tpu.memory_space<vmem>>, vector<1x32x4xf32>
    %8 = vector.shape_cast %7 : vector<1x32x4xf32> to vector<32x4xf32>
    %cst_8 = arith.constant dense<0.000000e+00> : vector<32x384xf32>
    %9 = tpu.matmul %8, %6, %cst_8 {dimension_numbers = #tpu.dot_dimension_numbers<[1], [0], [0], [1], [0, 0, 1, 1], [], []>} : vector<32x4xf32>, vector<4x384xf32>, vector<32x384xf32> -> vector<32x384xf32>
    %10 = arith.addf %5, %9 : vector<32x384xf32>
    %11 = vector.extract_strided_slice %4 {offsets = [0, 1], sizes = [4, 384], strides = [1, 1]} : vector<4x768xf32> to vector<4x384xf32>
    %c1 = arith.constant 1 : index
    %c0_9 = arith.constant 0 : index
    %c0_10 = arith.constant 0 : index
    %12 = vector.load %arg4[%c1, %c0_9, %c0_10] : memref<9x32x4xf32, #tpu.memory_space<vmem>>, vector<1x32x4xf32>
    %13 = vector.shape_cast %12 : vector<1x32x4xf32> to vector<32x4xf32>
    %cst_11 = arith.constant dense<0.000000e+00> : vector<32x384xf32>
    %14 = tpu.matmul %13, %11, %cst_11 {dimension_numbers = #tpu.dot_dimension_numbers<[1], [0], [0], [1], [0, 0, 1, 1], [], []>} : vector<32x4xf32>, vector<4x384xf32>, vector<32x384xf32> -> vector<32x384xf32>
    %15 = arith.addf %10, %14 : vector<32x384xf32>
    %16 = vector.extract_strided_slice %4 {offsets = [0, 2], sizes = [4, 384], strides = [1, 1]} : vector<4x768xf32> to vector<4x384xf32>
    %c2 = arith.constant 2 : index
    %c0_12 = arith.constant 0 : index
    %c0_13 = arith.constant 0 : index
    %17 = vector.load %arg4[%c2, %c0_12, %c0_13] : memref<9x32x4xf32, #tpu.memory_space<vmem>>, vector<1x32x4xf32>
    %18 = vector.shape_cast %17 : vector<1x32x4xf32> to vector<32x4xf32>
    %cst_14 = arith.constant dense<0.000000e+00> : vector<32x384xf32>
    %19 = tpu.matmul %18, %16, %cst_14 {dimension_numbers = #tpu.dot_dimension_numbers<[1], [0], [0], [1], [0, 0, 1, 1], [], []>} : vector<32x4xf32>, vector<4x384xf32>, vector<32x384xf32> -> vector<32x384xf32>
    %20 = arith.addf %15, %19 : vector<32x384xf32>
    %21 = vector.extract_strided_slice %4 {offsets = [0, 18], sizes = [4, 384], strides = [1, 1]} : vector<4x768xf32> to vector<4x384xf32>
    %c3 = arith.constant 3 : index
    %c0_15 = arith.constant 0 : index
    %c0_16 = arith.constant 0 : index
    %22 = vector.load %arg4[%c3, %c0_15, %c0_16] : memref<9x32x4xf32, #tpu.memory_space<vmem>>, vector<1x32x4xf32>
    %23 = vector.shape_cast %22 : vector<1x32x4xf32> to vector<32x4xf32>
    %cst_17 = arith.constant dense<0.000000e+00> : vector<32x384xf32>
    %24 = tpu.matmul %23, %21, %cst_17 {dimension_numbers = #tpu.dot_dimension_numbers<[1], [0], [0], [1], [0, 0, 1, 1], [], []>} : vector<32x4xf32>, vector<4x384xf32>, vector<32x384xf32> -> vector<32x384xf32>
    %25 = arith.addf %20, %24 : vector<32x384xf32>
    %26 = vector.extract_strided_slice %4 {offsets = [0, 19], sizes = [4, 384], strides = [1, 1]} : vector<4x768xf32> to vector<4x384xf32>
    %c4 = arith.constant 4 : index
    %c0_18 = arith.constant 0 : index
    %c0_19 = arith.constant 0 : index
    %27 = vector.load %arg4[%c4, %c0_18, %c0_19] : memref<9x32x4xf32, #tpu.memory_space<vmem>>, vector<1x32x4xf32>
    %28 = vector.shape_cast %27 : vector<1x32x4xf32> to vector<32x4xf32>
    %cst_20 = arith.constant dense<0.000000e+00> : vector<32x384xf32>
    %29 = tpu.matmul %28, %26, %cst_20 {dimension_numbers = #tpu.dot_dimension_numbers<[1], [0], [0], [1], [0, 0, 1, 1], [], []>} : vector<32x4xf32>, vector<4x384xf32>, vector<32x384xf32> -> vector<32x384xf32>
    %30 = arith.addf %25, %29 : vector<32x384xf32>
    %31 = vector.extract_strided_slice %4 {offsets = [0, 20], sizes = [4, 384], strides = [1, 1]} : vector<4x768xf32> to vector<4x384xf32>
    %c5 = arith.constant 5 : index
    %c0_21 = arith.constant 0 : index
    %c0_22 = arith.constant 0 : index
    %32 = vector.load %arg4[%c5, %c0_21, %c0_22] : memref<9x32x4xf32, #tpu.memory_space<vmem>>, vector<1x32x4xf32>
    %33 = vector.shape_cast %32 : vector<1x32x4xf32> to vector<32x4xf32>
    %cst_23 = arith.constant dense<0.000000e+00> : vector<32x384xf32>
    %34 = tpu.matmul %33, %31, %cst_23 {dimension_numbers = #tpu.dot_dimension_numbers<[1], [0], [0], [1], [0, 0, 1, 1], [], []>} : vector<32x4xf32>, vector<4x384xf32>, vector<32x384xf32> -> vector<32x384xf32>
    %35 = arith.addf %30, %34 : vector<32x384xf32>
    %36 = vector.extract_strided_slice %4 {offsets = [0, 36], sizes = [4, 384], strides = [1, 1]} : vector<4x768xf32> to vector<4x384xf32>
    %c6 = arith.constant 6 : index
    %c0_24 = arith.constant 0 : index
    %c0_25 = arith.constant 0 : index
    %37 = vector.load %arg4[%c6, %c0_24, %c0_25] : memref<9x32x4xf32, #tpu.memory_space<vmem>>, vector<1x32x4xf32>
    %38 = vector.shape_cast %37 : vector<1x32x4xf32> to vector<32x4xf32>
    %cst_26 = arith.constant dense<0.000000e+00> : vector<32x384xf32>
    %39 = tpu.matmul %38, %36, %cst_26 {dimension_numbers = #tpu.dot_dimension_numbers<[1], [0], [0], [1], [0, 0, 1, 1], [], []>} : vector<32x4xf32>, vector<4x384xf32>, vector<32x384xf32> -> vector<32x384xf32>
    %40 = arith.addf %35, %39 : vector<32x384xf32>
    %41 = vector.extract_strided_slice %4 {offsets = [0, 37], sizes = [4, 384], strides = [1, 1]} : vector<4x768xf32> to vector<4x384xf32>
    %c7 = arith.constant 7 : index
    %c0_27 = arith.constant 0 : index
    %c0_28 = arith.constant 0 : index
    %42 = vector.load %arg4[%c7, %c0_27, %c0_28] : memref<9x32x4xf32, #tpu.memory_space<vmem>>, vector<1x32x4xf32>
    %43 = vector.shape_cast %42 : vector<1x32x4xf32> to vector<32x4xf32>
    %cst_29 = arith.constant dense<0.000000e+00> : vector<32x384xf32>
    %44 = tpu.matmul %43, %41, %cst_29 {dimension_numbers = #tpu.dot_dimension_numbers<[1], [0], [0], [1], [0, 0, 1, 1], [], []>} : vector<32x4xf32>, vector<4x384xf32>, vector<32x384xf32> -> vector<32x384xf32>
    %45 = arith.addf %40, %44 : vector<32x384xf32>
    %46 = vector.extract_strided_slice %4 {offsets = [0, 38], sizes = [4, 384], strides = [1, 1]} : vector<4x768xf32> to vector<4x384xf32>
    %c8 = arith.constant 8 : index
    %c0_30 = arith.constant 0 : index
    %c0_31 = arith.constant 0 : index
    %47 = vector.load %arg4[%c8, %c0_30, %c0_31] : memref<9x32x4xf32, #tpu.memory_space<vmem>>, vector<1x32x4xf32>
    %48 = vector.shape_cast %47 : vector<1x32x4xf32> to vector<32x4xf32>
    %cst_32 = arith.constant dense<0.000000e+00> : vector<32x384xf32>
    %49 = tpu.matmul %48, %46, %cst_32 {dimension_numbers = #tpu.dot_dimension_numbers<[1], [0], [0], [1], [0, 0, 1, 1], [], []>} : vector<32x4xf32>, vector<4x384xf32>, vector<32x384xf32> -> vector<32x384xf32>
    %50 = arith.addf %45, %49 : vector<32x384xf32>
    %c0_33 = arith.constant 0 : index
    %c0_34 = arith.constant 0 : index
    %51 = vector.load %arg5[%c0_33, %c0_34] : memref<32x2xf32, #tpu.memory_space<vmem>>, vector<32x1xf32>
    %c0_35 = arith.constant 0 : index
    %c1_36 = arith.constant 1 : index
    %52 = vector.load %arg5[%c0_35, %c1_36] : memref<32x2xf32, #tpu.memory_space<vmem>>, vector<32x1xf32>
    %53 = vector.broadcast %51 : vector<32x1xf32> to vector<32x384xf32>
    %54 = arith.mulf %50, %53 : vector<32x384xf32>
    %55 = vector.broadcast %52 : vector<32x1xf32> to vector<32x384xf32>
    %56 = arith.addf %54, %55 : vector<32x384xf32>
    %cst_37 = arith.constant 0.000000e+00 : f32
    %57 = vector.broadcast %cst_37 : f32 to vector<32x384xf32>
    %58 = arith.maximumf %56, %57 : vector<32x384xf32>
    %c0_38 = arith.constant 0 : index
    %c0_39 = arith.constant 0 : index
    %c0_40 = arith.constant 0 : index
    %59 = vector.load %arg6[%c0_38, %c0_39, %c0_40] : memref<1x32x384xf32, #tpu.memory_space<vmem>>, vector<1x32x384xf32>
    %60 = vector.shape_cast %59 : vector<1x32x384xf32> to vector<32x384xf32>
    %61 = vector.shape_cast %58 : vector<32x384xf32> to vector<1x32x384xf32>
    tpu.vector_store %arg6[%c0_38, %c0_39, %c0_40], %61 {strides = array<i32>} : memref<1x32x384xf32, #tpu.memory_space<vmem>>, vector<1x32x384xf32>,
    return
  }
  func.func @transform_0(%arg0: i32, %arg1: i32) -> (i32, i32, i32) {
    %c0_i32 = arith.constant 0 : i32
    %c0_i32_0 = arith.constant 0 : i32
    return %arg0, %c0_i32, %arg1 : i32, i32, i32
  }
  func.func @transform_1(%arg0: i32, %arg1: i32) -> (i32, i32, i32) {
    %c1_i32 = arith.constant 1 : i32
    %0 = arith.addi %arg1, %c1_i32 : i32
    %c0_i32 = arith.constant 0 : i32
    %c0_i32_0 = arith.constant 0 : i32
    return %arg0, %c0_i32, %0 : i32, i32, i32
  }
  func.func @transform_2(%arg0: i32, %arg1: i32) -> (i32, i32, i32) {
    %c0_i32 = arith.constant 0 : i32
    %c0_i32_0 = arith.constant 0 : i32
    %c0_i32_1 = arith.constant 0 : i32
    %c0_i32_2 = arith.constant 0 : i32
    return %c0_i32, %c0_i32_0, %c0_i32_1 : i32, i32, i32
  }
  func.func @transform_3(%arg0: i32, %arg1: i32) -> (i32, i32) {
    %c0_i32 = arith.constant 0 : i32
    %c0_i32_0 = arith.constant 0 : i32
    %c0_i32_1 = arith.constant 0 : i32
    return %c0_i32, %c0_i32_0 : i32, i32
  }
  func.func @transform_4(%arg0: i32, %arg1: i32) -> (i32, i32, i32) {
    %c0_i32 = arith.constant 0 : i32
    %c0_i32_0 = arith.constant 0 : i32
    return %arg0, %c0_i32, %arg1 : i32, i32, i32
  }
}

</mosaic_0001>

<bundles_post_ra>
// kernel: tpu_custom_call.1
= control target key start
LH: loop header
LB: loop body
LE: loop exit
PB: predicated region body
PF: predicated region fallthrough
CT: control target
= control target key end

     0   :  { %9 = vsyncpa [#allocation3], 0  ;;  %s3559_s0 = inlined_call_operand.vmem [shape: f32[2,4,768], index: 0, kind: input, shape index: {}]   ;;  %s3560_s1 = inlined_call_operand.vmem [shape: f32[2,4,768], index: 1, kind: input, shape index: {}]   ;;  %s3561_s2 = inlined_call_operand.vmem [shape: f32[9,32,4], index: 2, kind: input, shape index: {}]   ;;  %s3562_s3 = inlined_call_operand.vmem [shape: f32[32,2], index: 3, kind: input, shape index: {}]   ;;  %s3563_s4 = inlined_call_operand.hbm [shape: f32[2,32,384], index: 4, kind: output, shape index: {}]  }
   0x1   :  { %11 = vsyncpa [#allocation3 + $0x1], 0  ;;  %s2889_s15 = smov 0   ;;  %s2891_s16 = smov 0  }
   0x2   :  { %s2893_s17 = smov 0   ;;  %s2895_s18 = smov 0  }
   0x3   :  { %s2897_s19 = smov 0   ;;  %s2899_s20 = smov 0  }
   0x4 LB: > { %s2432_s21 = sadd.s32 4294967295, %s2848_s20   ;;  %s2433_s22 = sadd.s32 4294967294, %s2848_s20   ;;  %s2848_s20 = sphi %s2899_s20, %s17_s20   ;;  %s2844_s19 = sphi %s2897_s19, %s3604_s19   ;;  %s2840_s18 = sphi %s2895_s18, %s3603_s18   ;;  %s2836_s17 = sphi %s2893_s17, %s3602_s17   ;;  %s2832_s16 = sphi %s2891_s16, %s3601_s16   ;;  %s2828_s15 = sphi %s2889_s15, %s3600_s15  }
   0x5   : > { %s29_s23 = sadd.s32 1, %s2844_s19  ;;  %s138_s24 = sadd.s32 1, %s2836_s17 }
   0x6   : > { %p31_p0 = scmp.ge.s32.totalorder %s29_s23, 2  ;;  %p148_p1 = scmp.ne.s32.totalorder %s2836_s17, %s2832_s16 }
   0x7   : > { %p149_p2 = scmp.eq.s32.totalorder %s2432_s21, 1  ;;  %p154_p3 = scmp.ne.s32.totalorder %s2832_s16, %s2828_s15 }
   0x8   : > { %s3606_s23 = smov (%p31_p0, %s29_s23), 0  ;;  %p155_p5 = scmp.eq.s32.totalorder %s2433_s22, 1 }
   0x9   : > { %p2929_p4 = por %p149_p2, %p148_p1  ;;  %s133_s26 = ssub.s32 %s2844_s19, %s3606_s23 }
   0xa   : > { %p2436_p6 = scmp.ge.s32.totalorder %s2848_s20, 1  ;;  %p136_p7 = scmp.eq.s32.totalorder %s133_s26, 0 }
   0xb   : > { %p2936_p8 = por %p155_p5, %p154_p3  ;;  %p207_p9 = scmp.lt.s32.totalorder %s2848_s20, 3 }
   0xc   : > { %s2942_s28 = scalar_select %p136_p7, %s2836_s17, %s138_s24  }
   0xd   : > { %p208_p10 = pnand %p2436_p6, %p207_p9 }
   0xf   : > { %211 = sbr.rel (%p208_p10) target bundleno = 474 (0x1da), region = 36 }
  0x14   : > { %p248_p11 = scmp.lt.s32.totalorder %s2840_s18, 1  ;;  %v2850_v0 = vmov 0.0   ;;  %s2851_s12 = smov 127   ;;  %v2232_v5 = vld [vmem:[%s3562_s3 + $0x8] sm:$0xff]  ;;  %v2231_v6 = vld [vmem:[%s3562_s3] sm:$0xff]  ;;  %v2859_v7 = vmov 0  }
  0x15   : > { %382 = vmatprep.mubr.f32.mxu0 %v2850_v0  ;;  %400 = vmatprep.mubr.f32.mxu1 %v2850_v0  ;;  %s2852_s13 = smov 126   ;;  %s2853_s14 = smov 110   ;;  %v2233_v8 = vld [vmem:[%s3562_s3 + $0x10] sm:$0xff]  ;;  %v2234_v9 = vld [vmem:[%s3562_s3 + $0x18] sm:$0xff]  ;;  %v2860_v10 = vmov 1   ;;  %vm294_vm0 = vcmask 1039360  }
  0x16   : > { %s249_s29 = scalar_select %p248_p11, %s2840_s18, 1  ;;  %2768 = vset.pattern.permute.xlu1 %v2859_v7  ;;  %2767 = vset.pattern.permute.xlu0 %v2859_v7  ;;  %vm311_vm1 = vcmask 1043456   ;;  %v2439_v16 = vld [vmem:[%s3561_s2 + $0x20] sm:$0xff]  ;;  %vm298_vm2 = vcmask 31744   ;;  %v2442_v17 = vld [vmem:[%s3561_s2 + $0x38] sm:$0xff]  ;;  %vm697_vm3 = vcmask 1031168  }
  0x17   : > { %s2854_s21 = smov 109   ;;  %s2855_s22 = smov 108   ;;  %v2440_v22 = vld [vmem:[%s3561_s2 + $0x28] sm:$0xff]  ;;  %v2441_v24 = vld [vmem:[%s3561_s2 + $0x30] sm:$0xff]  ;;  %v277_v29 = vld [vmem:[%s3561_s2] sm:$0xff]  ;;  %vm918_vm4 = vcmask 900096  }
  0x18   : > { %s2695_s30 = smul.u32 24, %s249_s29  ;;  %s2856_s24 = smov 92   ;;  %v278_v31 = vld [vmem:[%s3561_s2 + $0x8] sm:$0xff]  ;;  %v279_v33 = vld [vmem:[%s3561_s2 + $0x10] sm:$0xff]  ;;  %v280_v37 = vld [vmem:[%s3561_s2 + $0x18] sm:$0xff]  ;;  %vm1139_vm5 = vcmask 891904  }
  0x19   : > { %s2857_s26 = smov 91   ;;  %s2858_s29 = smov 90   ;;  %v2465_v40 = vld [vmem:[%s3561_s2 + $0x40] sm:$0xff]  ;;  %v2466_v43 = vld [vmem:[%s3561_s2 + $0x48] sm:$0xff]  ;;  %v2467_v46 = vld [vmem:[%s3561_s2 + $0x50] sm:$0xff]  ;;  %vm1360_vm6 = vcmask 883712  }
  0x1a   : > { %s255_s7 = scalar_lea.vmem %s3559_s0, %s2695_s30  ;;  %s2574_s8 = sadd.s32 12, %s2695_s30  ;;  %v2468_v50 = vld [vmem:[%s3561_s2 + $0x58] sm:$0xff]  ;;  %v2480_v52 = vld [vmem:[%s3561_s2 + $0x60] sm:$0xff]  ;;  %v2481_v53 = vld [vmem:[%s3561_s2 + $0x68] sm:$0xff]  ;;  %vm1581_vm7 = vcmask 752640   ;;  %vm1802_vm8 = vcmask 744448  }
  0x1b   : > { %v2951_v1 = vld [vmem:[%s255_s7] sm:$0xff]  ;;  %s266_s11 = scalar_lea.vmem %s3560_s1, %s2574_s8  ;;  %v2962_v4 = vld [vmem:[%s255_s7 + $0x8] sm:$0xf]  ;;  %v2482_v56 = vld [vmem:[%s3561_s2 + $0x70] sm:$0xff]  ;;  %vm2023_vm9 = vcmask 736256   ;;  %s244_s30 = sand.u32 1, %s2832_s16  }
  0x1c   : > { %286 = vrot.lane.b32.xlu1 %v2951_v1, %s2851_s12  ;;  %v2959_v2 = vcombine.high %v2951_v1, %v2951_v1  ;;  %v272_v3 = vld [vmem:[%s266_s11] sm:$0xff]  ;;  %v2483_v60 = vld [vmem:[%s3561_s2 + $0x78] sm:$0xff]  ;;  %s3454_s5 = smul.u32 96, %s244_s30  ;;  %s3514_s11 = scalar_lea.sflag [#allocation3], %s244_s30 }
  0x1d   : > { %v2495_v62 = vld [vmem:[%s3561_s2 + $0x80] sm:$0xff]  ;;  %s2697_s7 = smul.u32 1536, %s2840_s18 }
  0x1e   : > { %288 = vrot.lane.b32.xlu0 %v2959_v2, %s2851_s12  ;;  %s3475_s6 = scalar_lea.vmem [#allocation2], %s3454_s5 }
  0x1f   : > { %s2335_s8 = sshll.u32 %s3475_s6, 4  ;;  %s3505_s10 = scalar_lea.hbm %s3563_s4, %s2697_s7  ;;  %s3507_s8 = int_to_ptr.vmem [resolvable:$true] %s2335_s8 }
  0x20   : > { %292 = vrot.lane.b32.xlu1 %v272_v3, %s2851_s12 }
  0x22   : > { %290 = vrot.lane.b32.xlu0 %v2962_v4, %s2851_s12  ;;  %s2772_s12 = scalar_lea.vmem %s3507_s8, 1536 }
  0x23   : > { %p2773_p12 = scmp.ne.s32.totalorder %s3507_s8, %s2772_s12 }
  0x24   : > { %693 = vrot.lane.b32.xlu1 %v2962_v4, %s2852_s13 }
  0x25   : > { %p2774_p13 = pnand %p2773_p12, %p2929_p4 }
  0x26   : > { %691 = vrot.lane.b32.xlu0 %v2959_v2, %s2852_s13 }
  0x27   : > { %p2775_p0 = pneg %p2774_p13 }
  0x28   : > { %695 = vrot.lane.b32.xlu1 %v272_v3, %s2852_s13 }
  0x2a   : > { %689 = vrot.lane.b32.xlu0 %v2951_v1, %s2852_s13  ;;  %s2861_s13 = smov [#allocation2]  }
  0x2c   : > { %914 = vrot.lane.b32.xlu1 %v2962_v4, %s2853_s14 }
  0x2e   : > { %912 = vrot.lane.b32.xlu0 %v2959_v2, %s2853_s14 }
  0x30   : > { %910 = vrot.lane.b32.xlu1 %v2951_v1, %s2853_s14 }
  0x32   : > { %916 = vrot.lane.b32.xlu0 %v272_v3, %s2853_s14  ;;  %s2776_s14 = sshll.u32 %s2861_s13, 4  ;;  %s2777_s14 = int_to_ptr.vmem [resolvable:$false] %s2776_s14 }
  0x33   : > { %p2779_p1 = scmp.lt.s32.totalorder %s3507_s8, %s2777_s14 }
  0x34   : > { %1135 = vrot.lane.b32.xlu1 %v2962_v4, %s2854_s21 }
  0x36   : > { %1133 = vrot.lane.b32.xlu0 %v2959_v2, %s2854_s21 }
  0x38   : > { %1137 = vrot.lane.b32.xlu1 %v272_v3, %s2854_s21 }
  0x3a   : > { %1131 = vrot.lane.b32.xlu0 %v2951_v1, %s2854_s21  ;;  %s2778_s21 = scalar_lea.vmem %s2777_s14, 3072 }
  0x3b   : > { %p2780_p2 = scmp.lt.s32.totalorder %s2778_s21, %s2772_s12 }
  0x3c   : > { %1356 = vrot.lane.b32.xlu1 %v2962_v4, %s2855_s22 }
  0x3d   : > { %p2781_p3 = por %p2780_p2, %p2779_p1 }
  0x3e   : > { %1354 = vrot.lane.b32.xlu0 %v2959_v2, %s2855_s22 }
  0x3f   : > { %p2782_p5 = pnand %p2781_p3, %p2775_p0 }
  0x40   : > { %1352 = vrot.lane.b32.xlu1 %v2951_v1, %s2855_s22 }
  0x42   : > { %1358 = vrot.lane.b32.xlu0 %v272_v3, %s2855_s22 }
  0x44   : > { %1577 = vrot.lane.b32.xlu1 %v2962_v4, %s2856_s24 }
  0x46   : > { %1575 = vrot.lane.b32.xlu0 %v2959_v2, %s2856_s24 }
  0x48   : > { %1579 = vrot.lane.b32.xlu1 %v272_v3, %s2856_s24 }
  0x4a   : > { %1573 = vrot.lane.b32.xlu0 %v2951_v1, %s2856_s24 }
  0x4c   : > { %1798 = vrot.lane.b32.xlu1 %v2962_v4, %s2857_s26 }
  0x4e   : > { %1796 = vrot.lane.b32.xlu0 %v2959_v2, %s2857_s26 }
  0x50   : > { %1794 = vrot.lane.b32.xlu1 %v2951_v1, %s2857_s26 }
  0x52   : > { %1800 = vrot.lane.b32.xlu0 %v272_v3, %s2857_s26 }
  0x54   : > { %2019 = vrot.lane.b32.xlu1 %v2962_v4, %s2858_s29 }
  0x56   : > { %2017 = vrot.lane.b32.xlu0 %v2959_v2, %s2858_s29 }
  0x58   : > { %2021 = vrot.lane.b32.xlu1 %v272_v3, %s2858_s29 }
  0x5a   : > { %2015 = vrot.lane.b32.xlu0 %v2951_v1, %s2858_s29 }
  0x5c   : > { %2242 = vperm.xlu1 %2768, %v2232_v5  }
  0x5e   : > { %2237 = vperm.xlu0 %2767, %v2231_v6  }
  0x60   : > { %2247 = vperm.xlu1 %2768, %v2233_v8  }
  0x62   : > { %2252 = vperm.xlu0 %2767, %v2234_v9  }
  0x64   : > { %2769 = vset.pattern.permute.xlu1 %v2860_v10 }
  0x65   : > { %2268 = vperm.xlu1 %2769, %v2231_v6  }
  0x66   : > { %2770 = vset.pattern.permute.xlu0 %v2860_v10 }
  0x67   : > { %2272 = vperm.xlu0 %2770, %v2232_v5   ;;  %v2497_v5 = vld [vmem:[%s3561_s2 + $0x90] sm:$0xff] }
  0x69   : > { %2276 = vperm.xlu1 %2769, %v2233_v8  }
  0x6d   : > { %2280 = vperm.xlu1 %2769, %v2234_v9   ;;  %v2498_v9 = vld [vmem:[%s3561_s2 + $0x98] sm:$0xff] }
  0x8e   : > { %v287_v11 = vpop.permute.xlu1 %286 }
  0x90   : > { %v289_v12 = vpop.permute.xlu0 %288 }
  0x91   : > { %v295_v18 = vsel %vm294_vm0, %v287_v11, %v289_v12  ;;  %v2510_v11 = vld [vmem:[%s3561_s2 + $0xa0] sm:$0xff] }
  0x92   : > { %v293_v13 = vpop.permute.xlu1 %292 }
  0x94   : > { %v291_v14 = vpop.permute.xlu0 %290 }
  0x95   : > { %v296_v15 = vsel %vm294_vm0, %v289_v12, %v291_v14  ;;  %v297_v20 = vsel %vm294_vm0, %v291_v14, %v293_v13  ;;  %v2511_v12 = vld [vmem:[%s3561_s2 + $0xa8] sm:$0xff] }
  0x96   : > { %2443 = vmatprep.subr.msk.mxu0 %vm311_vm1, %v296_v15  ;;  %2692 = vmatprep.subr.msk.mxu1 %vm311_vm1, %v296_v15  ;;  %v694_v19 = vpop.permute.xlu1 %693  ;;  %v2512_v15 = vld [vmem:[%s3561_s2 + $0xb0] sm:$0xff] }
  0x97   : > { %2444 = vmatpush1.msk.msra.mxu0 %vm311_vm1, %v295_v18  ;;  %2693 = vmatpush1.msk.msra.mxu1 %vm311_vm1, %v295_v18 }
  0x98   : > { %2445 = vmatmul.mubr.msk.f32.vlgmr.msra.gmra.mxu0 %vm298_vm2, %v2439_v16  ;;  %2448 = vmatmul.mubr.msk.f32.vlgmr.msra.gmra.mxu1 %vm298_vm2, %v2442_v17  ;;  %v692_v21 = vpop.permute.xlu0 %691 }
  0x99   : > { %2620 = vmatprep.subr.msk.mxu1 %vm311_vm1, %v297_v20  ;;  %2628 = vmatprep.subr.msk.mxu0 %vm311_vm1, %v2962_v4  ;;  %v699_v25 = vsel %vm697_vm3, %v692_v21, %v694_v19 }
  0x9a   : > { %2621 = vmatpush3.msk.msra.mxu1 %vm311_vm1, %v297_v20  ;;  %2629 = vmatpush3.msk.msra.mxu0 %vm311_vm1, %v2962_v4  ;;  %v696_v23 = vpop.permute.xlu1 %695 }
  0x9b   : > { %388 = vmatprep.mubr.f32.mxu0 %v2850_v0  ;;  %2622 = vmatprep.mubr.msk.f32.mxu1 %vm298_vm2, %v2439_v16  ;;  %v700_v26 = vsel %vm697_vm3, %v694_v19, %v696_v23  ;;  %v2513_v19 = vld [vmem:[%s3561_s2 + $0xb8] sm:$0xff] }
  0x9c   : > { %2446 = vmatmul.mubr.msk.f32.gmra.mxu0 %vm298_vm2, %v2440_v22  ;;  %2623 = vmatmul.mubr.msk.f32.vlgmr.msra.gmra.mxu1 %vm298_vm2, %v2440_v22  ;;  %v690_v27 = vpop.permute.xlu0 %689 }
  0x9d   : > { %2454 = vmatprep.subr.msk.mxu1 %vm311_vm1, %v2959_v2  ;;  %394 = vmatprep.mubr.f32.mxu0 %v2850_v0  ;;  %v698_v32 = vsel %vm697_vm3, %v690_v27, %v692_v21  ;;  %v2496_v2 = vld [vmem:[%s3561_s2 + $0x88] sm:$0xff]  ;;  %v2525_v21 = vld [vmem:[%s3561_s2 + $0xc0] sm:$0xff] }
  0x9e   : > { %2455 = vmatpush1.msk.msra.mxu1 %vm311_vm1, %v2951_v1  ;;  %2625 = vmatprep.mubr.msk.f32.mxu1 %vm298_vm2, %v2441_v24  ;;  %v915_v28 = vpop.permute.xlu1 %914 }
  0x9f   : > { %2469 = vmatprep.subr.msk.mxu0 %vm311_vm1, %v699_v25  ;;  %2636 = vmatprep.subr.msk.mxu1 %vm311_vm1, %v700_v26 }
  0xa0   : > { %2447 = vmatmul.mubr.msk.f32.gmra.mxu0 %vm298_vm2, %v2441_v24  ;;  %2626 = vmatmul.mubr.msk.f32.gmra.mxu1 %vm298_vm2, %v2442_v17  ;;  %v913_v30 = vpop.permute.xlu0 %912  ;;  %v2526_v24 = vld [vmem:[%s3561_s2 + $0xc8] sm:$0xff] }
  0xa1   : > { %574 = vmatprep.mubr.f32.mxu1 %v2850_v0  ;;  %2630 = vmatprep.mubr.msk.f32.mxu0 %vm298_vm2, %v277_v29  ;;  %v920_v34 = vsel %vm918_vm4, %v913_v30, %v915_v28 }
  0xa2   : > { %v911_v35 = vpop.permute.xlu1 %910 }
  0xa3   : > { %v919_v47 = vsel %vm918_vm4, %v911_v35, %v913_v30  ;;  %v2540_v30 = vld [vmem:[%s3561_s2 + $0xe0] sm:$0xff]  ;;  %v2543_v35 = vld [vmem:[%s3561_s2 + $0xf8] sm:$0xff] }
  0xa4   : > { %2456 = vmatmul.mubr.msk.f32.vlgmr.msra.gmra.mxu1 %vm298_vm2, %v277_v29  ;;  %2631 = vmatmul.mubr.msk.f32.vlgmr.msra.gmra.mxu0 %vm298_vm2, %v278_v31  ;;  %v917_v36 = vpop.permute.xlu0 %916  ;;  %v2528_v29 = vld [vmem:[%s3561_s2 + $0xd8] sm:$0xff] }
  0xa5   : > { %2470 = vmatpush1.msk.msra.mxu0 %vm311_vm1, %v698_v32  ;;  %2637 = vmatpush3.msk.msra.mxu1 %vm311_vm1, %v700_v26  ;;  %v921_v38 = vsel %vm918_vm4, %v915_v28, %v917_v36  ;;  %v2527_v26 = vld [vmem:[%s3561_s2 + $0xd0] sm:$0xff]  ;;  %v2541_v32 = vld [vmem:[%s3561_s2 + $0xe8] sm:$0xff]  ;;  %v2555_v36 = vld [vmem:[%s3561_s2 + $0x100] sm:$0xff] }
  0xa6   : > { %580 = vmatprep.mubr.f32.mxu1 %v2850_v0  ;;  %2633 = vmatprep.mubr.msk.f32.mxu0 %vm298_vm2, %v279_v33  ;;  %v1136_v39 = vpop.permute.xlu1 %1135 }
  0xa7   : > { %2484 = vmatprep.subr.msk.mxu1 %vm311_vm1, %v920_v34  ;;  %2644 = vmatprep.subr.msk.mxu0 %vm311_vm1, %v921_v38  ;;  %v2542_v34 = vld [vmem:[%s3561_s2 + $0xf0] sm:$0xff] }
  0xa8   : > { %2457 = vmatmul.mubr.msk.f32.gmra.mxu1 %vm298_vm2, %v278_v31  ;;  %2634 = vmatmul.mubr.msk.f32.gmra.mxu0 %vm298_vm2, %v280_v37  ;;  %v1134_v41 = vpop.permute.xlu0 %1133 }
  0xa9   : > { %586 = vmatprep.mubr.f32.mxu1 %v2850_v0  ;;  %783 = vmatprep.mubr.f32.mxu0 %v2850_v0  ;;  %v1141_v42 = vsel %vm1139_vm5, %v1134_v41, %v1136_v39 }
  0xaa   : > { %v1138_v45 = vpop.permute.xlu1 %1137 }
  0xab   : > { %v1142_v48 = vsel %vm1139_vm5, %v1136_v39, %v1138_v45  ;;  %v2558_v39 = vld [vmem:[%s3561_s2 + $0x118] sm:$0xff] }
  0xac   : > { %2458 = vmatmul.mubr.msk.f32.gmra.mxu1 %vm298_vm2, %v279_v33  ;;  %2471 = vmatmul.mubr.msk.f32.vlgmr.msra.gmra.mxu0 %vm298_vm2, %v2465_v40  ;;  %v1132_v44 = vpop.permute.xlu0 %1131 }
  0xad   : > { %2645 = vmatpush3.msk.msra.mxu0 %vm311_vm1, %v921_v38  ;;  %592 = vmatprep.mubr.f32.mxu1 %v2850_v0  ;;  %v1140_v55 = vsel %vm1139_vm5, %v1132_v44, %v1134_v41  ;;  %v2557_v38 = vld [vmem:[%s3561_s2 + $0x110] sm:$0xff] }
  0xae   : > { %789 = vmatprep.mubr.f32.mxu0 %v2850_v0  ;;  %2499 = vmatprep.subr.msk.mxu0 %vm311_vm1, %v1141_v42  ;;  %v1357_v51 = vpop.permute.xlu1 %1356 }
  0xb0   : > { %2459 = vmatmul.mubr.msk.f32.gmra.mxu1 %vm298_vm2, %v280_v37  ;;  %2472 = vmatmul.mubr.msk.f32.gmra.mxu0 %vm298_vm2, %v2466_v43  ;;  %v1355_v49 = vpop.permute.xlu0 %1354  ;;  %v2556_v37 = vld [vmem:[%s3561_s2 + $0x108] sm:$0xff] }
  0xb1   : > { %795 = vmatprep.mubr.f32.mxu0 %v2850_v0  ;;  %2638 = vmatprep.mubr.msk.f32.mxu1 %vm298_vm2, %v2465_v40  ;;  %v1362_v57 = vsel %vm1360_vm6, %v1355_v49, %v1357_v51 }
  0xb2   : > { %v1353_v58 = vpop.permute.xlu1 %1352 }
  0xb3   : > { %v1361_v6 = vsel %vm1360_vm6, %v1353_v58, %v1355_v49 }
  0xb4   : > { %2473 = vmatmul.mubr.msk.f32.gmra.mxu0 %vm298_vm2, %v2467_v46  ;;  %2639 = vmatmul.mubr.msk.f32.vlgmr.msra.gmra.mxu1 %vm298_vm2, %v2466_v43  ;;  %v1359_v54 = vpop.permute.xlu0 %1358 }
  0xb5   : > { %2485 = vmatpush1.msk.msra.mxu1 %vm311_vm1, %v919_v47  ;;  %801 = vmatprep.mubr.f32.mxu0 %v2850_v0  ;;  %v1363_v59 = vsel %vm1360_vm6, %v1357_v51, %v1359_v54 }
  0xb6   : > { %2641 = vmatprep.mubr.msk.f32.mxu1 %vm298_vm2, %v2467_v46  ;;  %2652 = vmatprep.subr.msk.mxu1 %vm311_vm1, %v1142_v48  ;;  %v1578_v61 = vpop.permute.xlu1 %1577 }
  0xb8   : > { %2474 = vmatmul.mubr.msk.f32.gmra.mxu0 %vm298_vm2, %v2468_v50  ;;  %2642 = vmatmul.mubr.msk.f32.gmra.mxu1 %vm298_vm2, %v2468_v50  ;;  %v1576_v63 = vpop.permute.xlu0 %1575 }
  0xb9   : > { %1004 = vmatprep.mubr.f32.mxu1 %v2850_v0  ;;  %2646 = vmatprep.mubr.msk.f32.mxu0 %vm298_vm2, %v2480_v52  ;;  %v1583_v1 = vsel %vm1581_vm7, %v1576_v63, %v1578_v61 }
  0xba   : > { %v1580_v4 = vpop.permute.xlu1 %1579 }
  0xbb   : > { %v1584_v7 = vsel %vm1581_vm7, %v1578_v61, %v1580_v4 }
  0xbc   : > { %2486 = vmatmul.mubr.msk.f32.vlgmr.msra.gmra.mxu1 %vm298_vm2, %v2480_v52  ;;  %2647 = vmatmul.mubr.msk.f32.vlgmr.msra.gmra.mxu0 %vm298_vm2, %v2481_v53  ;;  %v1574_v3 = vpop.permute.xlu0 %1573 }
  0xbd   : > { %2500 = vmatpush1.msk.msra.mxu0 %vm311_vm1, %v1140_v55  ;;  %2653 = vmatpush3.msk.msra.mxu1 %vm311_vm1, %v1142_v48  ;;  %v1582_v14 = vsel %vm1581_vm7, %v1574_v3, %v1576_v63 }
  0xbe   : > { %1010 = vmatprep.mubr.f32.mxu1 %v2850_v0  ;;  %2649 = vmatprep.mubr.msk.f32.mxu0 %vm298_vm2, %v2482_v56  ;;  %v1799_v10 = vpop.permute.xlu1 %1798 }
  0xbf   : > { %2514 = vmatprep.subr.msk.mxu1 %vm311_vm1, %v1362_v57  ;;  %2660 = vmatprep.subr.msk.mxu0 %vm311_vm1, %v1363_v59 }
  0xc0   : > { %2487 = vmatmul.mubr.msk.f32.gmra.mxu1 %vm298_vm2, %v2481_v53  ;;  %2650 = vmatmul.mubr.msk.f32.gmra.mxu0 %vm298_vm2, %v2483_v60  ;;  %v1797_v8 = vpop.permute.xlu0 %1796 }
  0xc1   : > { %1016 = vmatprep.mubr.f32.mxu1 %v2850_v0  ;;  %1225 = vmatprep.mubr.f32.mxu0 %v2850_v0  ;;  %v1804_v16 = vsel %vm1802_vm8, %v1797_v8, %v1799_v10 }
  0xc2   : > { %v1795_v17 = vpop.permute.xlu1 %1794 }
  0xc3   : > { %v1803_v27 = vsel %vm1802_vm8, %v1795_v17, %v1797_v8 }
  0xc4   : > { %2488 = vmatmul.mubr.msk.f32.gmra.mxu1 %vm298_vm2, %v2482_v56  ;;  %2501 = vmatmul.mubr.msk.f32.vlgmr.msra.gmra.mxu0 %vm298_vm2, %v2495_v62  ;;  %v1801_v13 = vpop.permute.xlu0 %1800 }
  0xc5   : > { %2661 = vmatpush3.msk.msra.mxu0 %vm311_vm1, %v1363_v59  ;;  %1022 = vmatprep.mubr.f32.mxu1 %v2850_v0  ;;  %v1805_v18 = vsel %vm1802_vm8, %v1799_v10, %v1801_v13 }
  0xc6   : > { %1231 = vmatprep.mubr.f32.mxu0 %v2850_v0  ;;  %2529 = vmatprep.subr.msk.mxu0 %vm311_vm1, %v1583_v1  ;;  %v2020_v20 = vpop.permute.xlu1 %2019 }
  0xc8   : > { %2489 = vmatmul.mubr.msk.f32.gmra.mxu1 %vm298_vm2, %v2483_v60  ;;  %2502 = vmatmul.mubr.msk.f32.gmra.mxu0 %vm298_vm2, %v2496_v2  ;;  %v2018_v22 = vpop.permute.xlu0 %2017 }
  0xc9   : > { %1237 = vmatprep.mubr.f32.mxu0 %v2850_v0  ;;  %2654 = vmatprep.mubr.msk.f32.mxu1 %vm298_vm2, %v2495_v62  ;;  %v2025_v23 = vsel %vm2023_vm9, %v2018_v22, %v2020_v20 }
  0xca   : > { %v2022_v25 = vpop.permute.xlu1 %2021 }
  0xcb   : > { %v2026_v28 = vsel %vm2023_vm9, %v2020_v20, %v2022_v25 }
  0xcc   : > { %2503 = vmatmul.mubr.msk.f32.gmra.mxu0 %vm298_vm2, %v2497_v5  ;;  %2655 = vmatmul.mubr.msk.f32.vlgmr.msra.gmra.mxu1 %vm298_vm2, %v2496_v2  ;;  %v2016_v31 = vpop.permute.xlu0 %2015 }
  0xcd   : > { %2515 = vmatpush1.msk.msra.mxu1 %vm311_vm1, %v1361_v6  ;;  %1243 = vmatprep.mubr.f32.mxu0 %v2850_v0  ;;  %v2024_v33 = vsel %vm2023_vm9, %v2016_v31, %v2018_v22 }
  0xce   : > { %2657 = vmatprep.mubr.msk.f32.mxu1 %vm298_vm2, %v2497_v5  ;;  %2668 = vmatprep.subr.msk.mxu1 %vm311_vm1, %v1584_v7 }
  0xd0   : > { %2504 = vmatmul.mubr.msk.f32.gmra.mxu0 %vm298_vm2, %v2498_v9  ;;  %2658 = vmatmul.mubr.msk.f32.gmra.mxu1 %vm298_vm2, %v2498_v9 }
  0xd1   : > { %1446 = vmatprep.mubr.f32.mxu1 %v2850_v0  ;;  %2662 = vmatprep.mubr.msk.f32.mxu0 %vm298_vm2, %v2510_v11 }
  0xd4   : > { %2516 = vmatmul.mubr.msk.f32.vlgmr.msra.gmra.mxu1 %vm298_vm2, %v2510_v11  ;;  %2663 = vmatmul.mubr.msk.f32.vlgmr.msra.gmra.mxu0 %vm298_vm2, %v2511_v12 }
  0xd5   : > { %2530 = vmatpush1.msk.msra.mxu0 %vm311_vm1, %v1582_v14  ;;  %2669 = vmatpush3.msk.msra.mxu1 %vm311_vm1, %v1584_v7 }
  0xd6   : > { %1452 = vmatprep.mubr.f32.mxu1 %v2850_v0  ;;  %2665 = vmatprep.mubr.msk.f32.mxu0 %vm298_vm2, %v2512_v15 }
  0xd7   : > { %2544 = vmatprep.subr.msk.mxu1 %vm311_vm1, %v1804_v16  ;;  %2676 = vmatprep.subr.msk.mxu0 %vm311_vm1, %v1805_v18 }
  0xd8   : > { %2517 = vmatmul.mubr.msk.f32.gmra.mxu1 %vm298_vm2, %v2511_v12  ;;  %2666 = vmatmul.mubr.msk.f32.gmra.mxu0 %vm298_vm2, %v2513_v19 }
  0xd9   : > { %1458 = vmatprep.mubr.f32.mxu1 %v2850_v0  ;;  %1667 = vmatprep.mubr.f32.mxu0 %v2850_v0 }
  0xdc   : > { %2518 = vmatmul.mubr.msk.f32.gmra.mxu1 %vm298_vm2, %v2512_v15  ;;  %2531 = vmatmul.mubr.msk.f32.vlgmr.msra.gmra.mxu0 %vm298_vm2, %v2525_v21 }
  0xdd   : > { %2677 = vmatpush3.msk.msra.mxu0 %vm311_vm1, %v1805_v18  ;;  %1464 = vmatprep.mubr.f32.mxu1 %v2850_v0 }
  0xde   : > { %1673 = vmatprep.mubr.f32.mxu0 %v2850_v0  ;;  %2559 = vmatprep.subr.msk.mxu0 %vm311_vm1, %v2025_v23 }
  0xe0   : > { %2519 = vmatmul.mubr.msk.f32.gmra.mxu1 %vm298_vm2, %v2513_v19  ;;  %2532 = vmatmul.mubr.msk.f32.gmra.mxu0 %vm298_vm2, %v2526_v24 }
  0xe1   : > { %1679 = vmatprep.mubr.f32.mxu0 %v2850_v0  ;;  %2670 = vmatprep.mubr.msk.f32.mxu1 %vm298_vm2, %v2525_v21 }
  0xe4   : > { %2533 = vmatmul.mubr.msk.f32.gmra.mxu0 %vm298_vm2, %v2527_v26  ;;  %2671 = vmatmul.mubr.msk.f32.vlgmr.msra.gmra.mxu1 %vm298_vm2, %v2526_v24 }
  0xe5   : > { %2545 = vmatpush1.msk.msra.mxu1 %vm311_vm1, %v1803_v27  ;;  %1685 = vmatprep.mubr.f32.mxu0 %v2850_v0 }
  0xe6   : > { %2673 = vmatprep.mubr.msk.f32.mxu1 %vm298_vm2, %v2527_v26  ;;  %2684 = vmatprep.subr.msk.mxu1 %vm311_vm1, %v2026_v28 }
  0xe8   : > { %2534 = vmatmul.mubr.msk.f32.gmra.mxu0 %vm298_vm2, %v2528_v29  ;;  %2674 = vmatmul.mubr.msk.f32.gmra.mxu1 %vm298_vm2, %v2528_v29 }
  0xe9   : > { %1888 = vmatprep.mubr.f32.mxu1 %v2850_v0  ;;  %2678 = vmatprep.mubr.msk.f32.mxu0 %vm298_vm2, %v2540_v30 }
  0xec   : > { %2546 = vmatmul.mubr.msk.f32.vlgmr.msra.gmra.mxu1 %vm298_vm2, %v2540_v30  ;;  %2679 = vmatmul.mubr.msk.f32.vlgmr.msra.gmra.mxu0 %vm298_vm2, %v2541_v32 }
  0xed   : > { %2560 = vmatpush1.msk.msra.mxu0 %vm311_vm1, %v2024_v33  ;;  %2685 = vmatpush3.msk.msra.mxu1 %vm311_vm1, %v2026_v28 }
  0xee   : > { %1894 = vmatprep.mubr.f32.mxu1 %v2850_v0  ;;  %2681 = vmatprep.mubr.msk.f32.mxu0 %vm298_vm2, %v2542_v34 }
  0xf0   : > { %2547 = vmatmul.mubr.msk.f32.gmra.mxu1 %vm298_vm2, %v2541_v32  ;;  %2682 = vmatmul.mubr.msk.f32.gmra.mxu0 %vm298_vm2, %v2543_v35 }
  0xf1   : > { %1900 = vmatprep.mubr.f32.mxu1 %v2850_v0  ;;  %2109 = vmatprep.mubr.f32.mxu0 %v2850_v0 }
  0xf4   : > { %2548 = vmatmul.mubr.msk.f32.gmra.mxu1 %vm298_vm2, %v2542_v34  ;;  %2561 = vmatmul.mubr.msk.f32.vlgmr.msra.gmra.mxu0 %vm298_vm2, %v2555_v36 }
  0xf5   : > { %1906 = vmatprep.mubr.f32.mxu1 %v2850_v0  ;;  %2115 = vmatprep.mubr.f32.mxu0 %v2850_v0 }
  0xf8   : > { %2549 = vmatmul.mubr.msk.f32.gmra.mxu1 %vm298_vm2, %v2543_v35  ;;  %2562 = vmatmul.mubr.msk.f32.gmra.mxu0 %vm298_vm2, %v2556_v37 }
  0xf9   : > { %2121 = vmatprep.mubr.f32.mxu0 %v2850_v0  ;;  %2686 = vmatprep.mubr.msk.f32.mxu1 %vm298_vm2, %v2555_v36 }
  0xfc   : > { %2563 = vmatmul.mubr.msk.f32.gmra.mxu0 %vm298_vm2, %v2557_v38  ;;  %2687 = vmatmul.mubr.msk.f32.vlgmr.msra.gmra.mxu1 %vm298_vm2, %v2556_v37 }
  0xfd   : > { %2127 = vmatprep.mubr.f32.mxu0 %v2850_v0  ;;  %2689 = vmatprep.mubr.msk.f32.mxu1 %vm298_vm2, %v2557_v38 }
 0x100   : > { %2564 = vmatmul.mubr.msk.f32.gmra.mxu0 %vm298_vm2, %v2558_v39  ;;  %2690 = vmatmul.mubr.msk.f32.gmra.mxu1 %vm298_vm2, %v2558_v39 }
 0x158   : > { %v384_v40 = vpop.f32.mrf.mxu0  ;;  %v402_v41 = vpop.f32.mrf.mxu1 }
 0x15a   : > { %v386_v42 = vpop.f32.mrf.mxu0  ;;  %v404_v43 = vpop.f32.mrf.mxu1 }
 0x15c   : > { %v390_v44 = vpop.f32.mrf.mxu0  ;;  %v2624_v45 = vpop.f32.mrf.mxu1 }
 0x15e   : > { %v392_v46 = vpop.f32.mrf.mxu0  ;;  %v473_v47 = vpop.f32.mrf.mxu1 }
 0x160   : > { %v396_v48 = vpop.f32.mrf.mxu0  ;;  %v2627_v0 = vpop.f32.mrf.mxu1 }
 0x162   : > { %v398_v49 = vpop.f32.mrf.mxu0  ;;  %v483_v50 = vpop.f32.mrf.mxu1 }
 0x164   : > { %v576_v51 = vpop.f32.mrf.mxu1  ;;  %v2632_v52 = vpop.f32.mrf.mxu0 }
 0x165   : > { %v3275_v53 = vadd.f32 %v576_v51, %v384_v40  ;;  %v3277_v54 = vadd.f32 %v2632_v52, %v2624_v45 }
 0x166   : > { %v578_v55 = vpop.f32.mrf.mxu1  ;;  %v665_v56 = vpop.f32.mrf.mxu0 }
 0x167   : > { %v3279_v57 = vadd.f32 %v578_v55, %v386_v42  ;;  %v3281_v58 = vadd.f32 %v665_v56, %v473_v47 }
 0x168   : > { %v582_v59 = vpop.f32.mrf.mxu1  ;;  %v2635_v60 = vpop.f32.mrf.mxu0 }
 0x169   : > { %v3283_v61 = vadd.f32 %v582_v59, %v390_v44  ;;  %v3285_v62 = vadd.f32 %v2635_v60, %v2627_v0 }
 0x16a   : > { %v584_v63 = vpop.f32.mrf.mxu1  ;;  %v675_v1 = vpop.f32.mrf.mxu0 }
 0x16b   : > { %v3287_v2 = vadd.f32 %v584_v63, %v392_v46  ;;  %v3289_v3 = vadd.f32 %v675_v1, %v483_v50 }
 0x16c   : > { %v588_v4 = vpop.f32.mrf.mxu1  ;;  %v3291_v5 = vpop.f32.mrf.mxu0 }
 0x16d   : > { %v3293_v6 = vadd.f32 %v588_v4, %v396_v48 }
 0x16e   : > { %v590_v7 = vpop.f32.mrf.mxu1  ;;  %v3295_v8 = vpop.f32.mrf.mxu0 }
 0x16f   : > { %v3297_v9 = vadd.f32 %v590_v7, %v398_v49 }
 0x170   : > { %v594_v10 = vpop.f32.mrf.mxu1  ;;  %v791_v11 = vpop.f32.mrf.mxu0 }
 0x171   : > { %v3299_v12 = vadd.f32 %v594_v10, %v402_v41 }
 0x172   : > { %v596_v13 = vpop.f32.mrf.mxu1  ;;  %v793_v14 = vpop.f32.mrf.mxu0 }
 0x173   : > { %v3301_v15 = vadd.f32 %v596_v13, %v404_v43 }
 0x174   : > { %v797_v16 = vpop.f32.mrf.mxu0  ;;  %v2640_v17 = vpop.f32.mrf.mxu1 }
 0x176   : > { %v799_v18 = vpop.f32.mrf.mxu0  ;;  %v874_v19 = vpop.f32.mrf.mxu1 }
 0x178   : > { %v803_v20 = vpop.f32.mrf.mxu0  ;;  %v2643_v21 = vpop.f32.mrf.mxu1 }
 0x17a   : > { %v805_v22 = vpop.f32.mrf.mxu0  ;;  %v3303_v23 = vpop.f32.mrf.mxu1 }
 0x17c   : > { %v1006_v24 = vpop.f32.mrf.mxu1  ;;  %v3305_v25 = vpop.f32.mrf.mxu0 }
 0x17e   : > { %v3307_v26 = vpop.f32.mrf.mxu1  ;;  %v3309_v27 = vpop.f32.mrf.mxu0 }
 0x180   : > { %v3311_v28 = vpop.f32.mrf.mxu1  ;;  %v3313_v29 = vpop.f32.mrf.mxu0 }
 0x182   : > { %v3315_v30 = vpop.f32.mrf.mxu1  ;;  %v3317_v31 = vpop.f32.mrf.mxu0 }
 0x184   : > { %v3319_v32 = vpop.f32.mrf.mxu1  ;;  %v1227_v33 = vpop.f32.mrf.mxu0 }
 0x186   : > { %v3321_v34 = vpop.f32.mrf.mxu1  ;;  %v3323_v35 = vpop.f32.mrf.mxu0 }
 0x188   : > { %v3325_v36 = vpop.f32.mrf.mxu1  ;;  %v3327_v37 = vpop.f32.mrf.mxu0 }
 0x18a   : > { %v3329_v38 = vpop.f32.mrf.mxu1  ;;  %v3331_v39 = vpop.f32.mrf.mxu0 }
 0x18c   : > { %v3333_v40 = vpop.f32.mrf.mxu0  ;;  %v3335_v41 = vpop.f32.mrf.mxu1 }
 0x18e   : > { %v3337_v42 = vpop.f32.mrf.mxu0  ;;  %v3339_v43 = vpop.f32.mrf.mxu1 }
 0x190   : > { %v3341_v44 = vpop.f32.mrf.mxu0  ;;  %v3343_v45 = vpop.f32.mrf.mxu1 }
 0x192   : > { %v3345_v46 = vpop.f32.mrf.mxu0  ;;  %v3347_v47 = vpop.f32.mrf.mxu1 }
 0x194   : > { %v1448_v48 = vpop.f32.mrf.mxu1  ;;  %v3349_v0 = vpop.f32.mrf.mxu0 }
 0x195   : > { %3566 = vst [vmem:[#allocation5_spill] sm:$0xff] %v3349_v0  ;;  %v3398_v0 = vpop.permute.xlu1 %2242 }
 0x196   : > { %v1450_v49 = vpop.f32.mrf.mxu1  ;;  %v3351_v50 = vpop.f32.mrf.mxu0 }
 0x197   : > { %3567 = vst [vmem:[#allocation6_spill] sm:$0xff] %v3351_v50 }
 0x198   : > { %v3353_v51 = vpop.f32.mrf.mxu1  ;;  %v3355_v52 = vpop.f32.mrf.mxu0 }
 0x199   : > { %3568 = vst [vmem:[#allocation7_spill] sm:$0xff] %v3355_v52 }
 0x19a   : > { %v3357_v55 = vpop.f32.mrf.mxu1  ;;  %v3359_v56 = vpop.f32.mrf.mxu0 }
 0x19b   : > { %3569 = vst [vmem:[#allocation8_spill] sm:$0xff] %v3357_v55  ;;  %3570 = vst [vmem:[#allocation9_spill] sm:$0xff] %v3359_v56 }
 0x19c   : > { %v3361_v59 = vpop.f32.mrf.mxu1  ;;  %v1669_v60 = vpop.f32.mrf.mxu0 }
 0x19d   : > { %3571 = vst [vmem:[#allocation10_spill] sm:$0xff] %v3361_v59 }
 0x19e   : > { %v3363_v63 = vpop.f32.mrf.mxu1  ;;  %v1671_v1 = vpop.f32.mrf.mxu0 }
 0x19f   : > { %3572 = vst [vmem:[#allocation11_spill] sm:$0xff] %v3363_v63 }
 0x1a0   : > { %v3365_v4 = vpop.f32.mrf.mxu1  ;;  %v3367_v7 = vpop.f32.mrf.mxu0 }
 0x1a1   : > { %3573 = vst [vmem:[#allocation12_spill] sm:$0xff] %v3365_v4  ;;  %3574 = vst [vmem:[#allocation13_spill] sm:$0xff] %v3367_v7  ;;  %v893_v4 = vadd.f32 %v3291_v5, %v3275_v53  ;;  %v895_v53 = vadd.f32 %v874_v19, %v3281_v58 }
 0x1a2   : > { %v3369_v10 = vpop.f32.mrf.mxu1  ;;  %v3371_v13 = vpop.f32.mrf.mxu0 }
 0x1a3   : > { %3575 = vst [vmem:[#allocation14_spill] sm:$0xff] %v3369_v10  ;;  %3576 = vst [vmem:[#allocation15_spill] sm:$0xff] %v3371_v13  ;;  %v894_v10 = vadd.f32 %v3295_v8, %v3279_v57  ;;  %v896_v13 = vadd.f32 %v791_v11, %v3283_v61  ;;  %v902_v57 = vadd.f32 %v803_v20, %v3299_v12 }
 0x1a4   : > { %v3373_v50 = vpop.f32.mrf.mxu0  ;;  %v3375_v52 = vpop.f32.mrf.mxu1  ;;  %v904_v61 = vadd.f32 %v2643_v21, %v3285_v62  ;;  %v1116_v58 = vadd.f32 %v3309_v27, %v895_v53  ;;  %v3588_v53 = vld [vmem:[#allocation9_spill] sm:$0xff] }
 0x1a5   : > { %3577 = vst [vmem:[#allocation16_spill] sm:$0xff] %v3373_v50  ;;  %3578 = vst [vmem:[#allocation17_spill] sm:$0xff] %v3375_v52  ;;  %v897_v50 = vadd.f32 %v793_v14, %v3287_v2  ;;  %v903_v2 = vadd.f32 %v805_v22, %v3301_v15  ;;  %v3410_v14 = vpop.permute.xlu0 %2237  ;;  %v1117_v12 = vadd.f32 %v3311_v28, %v896_v13 }
 0x1a6   : > { %v3377_v55 = vpop.f32.mrf.mxu0  ;;  %v3379_v56 = vpop.f32.mrf.mxu1  ;;  %v1125_v62 = vadd.f32 %v3313_v29, %v904_v61  ;;  %v1123_v22 = vadd.f32 %v3325_v36, %v902_v57 }
 0x1a7   : > { %3579 = vst [vmem:[#allocation18_spill] sm:$0xff] %v3377_v55  ;;  %3580 = vst [vmem:[#allocation19_spill] sm:$0xff] %v3379_v56  ;;  %v899_v56 = vadd.f32 %v797_v16, %v3293_v6  ;;  %v1114_v55 = vadd.f32 %v1006_v24, %v893_v4  ;;  %v901_v6 = vadd.f32 %v3303_v23, %v3289_v3 }
 0x1a8   : > { %v3381_v59 = vpop.f32.mrf.mxu0  ;;  %v3383_v63 = vpop.f32.mrf.mxu1  ;;  %v1118_v15 = vadd.f32 %v3315_v30, %v897_v50  ;;  %v1338_v23 = vadd.f32 %v3327_v37, %v1117_v12  ;;  %v1124_v24 = vadd.f32 %v3329_v38, %v903_v2  ;;  %v1346_v38 = vadd.f32 %v3343_v45, %v1125_v62  ;;  %v3590_v2 = vld [vmem:[#allocation11_spill] sm:$0xff] }
 0x1a9   : > { %3581 = vst [vmem:[#allocation20_spill] sm:$0xff] %v3381_v59  ;;  %3582 = vst [vmem:[#allocation21_spill] sm:$0xff] %v3383_v63  ;;  %v898_v59 = vadd.f32 %v2640_v17, %v3277_v54  ;;  %v900_v63 = vadd.f32 %v799_v18, %v3297_v9  ;;  %v1115_v9 = vadd.f32 %v3307_v26, %v894_v10  ;;  %v3587_v10 = vld [vmem:[#allocation8_spill] sm:$0xff] }
 0x1aa   : > { %v3391_v7 = vpop.f32.mrf.mxu0  ;;  %v3393_v52 = vpop.f32.mrf.mxu1  ;;  %v1335_v11 = vadd.f32 %v1227_v33, %v1114_v55  ;;  %v1122_v3 = vadd.f32 %v3317_v31, %v901_v6  ;;  %v1120_v18 = vadd.f32 %v3319_v32, %v899_v56  ;;  %v1339_v27 = vadd.f32 %v3331_v39, %v1118_v15  ;;  %v3592_v15 = vld [vmem:[#allocation14_spill] sm:$0xff] }
 0x1ab   : > { %v1119_v54 = vadd.f32 %v3305_v25, %v898_v59  ;;  %v1336_v19 = vadd.f32 %v3323_v35, %v1115_v9  ;;  %v1121_v21 = vadd.f32 %v3321_v34, %v900_v63  ;;  %v3429_v31 = vpop.permute.xlu1 %2247  ;;  %v1337_v34 = vadd.f32 %v3339_v43, %v1116_v58  ;;  %v3583_v43 = vld [vmem:[#allocation5_spill] sm:$0xff] }
 0x1ac   : > { %v1890_v5 = vpop.f32.mrf.mxu1  ;;  %v3404_v8 = vpop.f32.mrf.mxu0  ;;  %v1556_v20 = vadd.f32 %v1448_v48, %v1335_v11  ;;  %v1341_v28 = vadd.f32 %v3333_v40, %v1120_v18  ;;  %v1344_v35 = vadd.f32 %v3341_v44, %v1123_v22  ;;  %v1559_v39 = vadd.f32 %v3353_v51, %v1338_v23  ;;  %v3584_v44 = vld [vmem:[#allocation6_spill] sm:$0xff]  ;;  %v3586_v63 = vld [vmem:[#allocation13_spill] sm:$0xff] }
 0x1ad   : > { %v1557_v29 = vadd.f32 %v1450_v49, %v1336_v19  ;;  %v1340_v32 = vadd.f32 %v3335_v41, %v1119_v54  ;;  %v1342_v33 = vadd.f32 %v3337_v42, %v1121_v21  ;;  %v3440_v49 = vpop.permute.xlu0 %2252  ;;  %v1345_v41 = vadd.f32 %v3345_v46, %v1124_v24  ;;  %v3589_v46 = vld [vmem:[#allocation10_spill] sm:$0xff]  ;;  %v3591_v54 = vld [vmem:[#allocation12_spill] sm:$0xff]  ;;  %v3595_v21 = vld [vmem:[#allocation17_spill] sm:$0xff] }
 0x1ae   : > { %v1892_v16 = vpop.f32.mrf.mxu1  ;;  %v3416_v17 = vpop.f32.mrf.mxu0  ;;  %v1777_v30 = vadd.f32 %v1669_v60, %v1556_v20  ;;  %v1343_v42 = vadd.f32 %v3347_v47, %v1122_v3  ;;  %v1558_v55 = vadd.f32 %v3584_v44, %v1337_v34  ;;  %v3585_v60 = vld [vmem:[#allocation7_spill] sm:$0xff]  ;;  %v1780_v51 = vadd.f32 %v3586_v63, %v1559_v39  ;;  %v3594_v19 = vld [vmem:[#allocation16_spill] sm:$0xff] }
 0x1af   : > { %v1778_v40 = vadd.f32 %v1671_v1, %v1557_v29  ;;  %v1561_v50 = vadd.f32 %v3583_v43, %v1340_v32  ;;  %v1567_v45 = vadd.f32 %v3585_v60, %v1346_v38  ;;  %v1560_v13 = vadd.f32 %v3587_v10, %v1339_v27  ;;  %v3458_v62 = vpop.permute.xlu1 %2268  ;;  %v3593_v3 = vld [vmem:[#allocation15_spill] sm:$0xff]  ;;  %v3596_v27 = vld [vmem:[#allocation18_spill] sm:$0xff] }
 0x1b0   : > { %v1896_v25 = vpop.f32.mrf.mxu1  ;;  %v3425_v26 = vpop.f32.mrf.mxu0  ;;  %v1998_v48 = vadd.f32 %v1890_v5, %v1777_v30  ;;  %v1564_v57 = vadd.f32 %v3588_v53, %v1343_v42  ;;  %v1562_v61 = vadd.f32 %v3589_v46, %v1341_v28  ;;  %v1563_v47 = vadd.f32 %v3590_v2, %v1342_v33  ;;  %v3597_v33 = vld [vmem:[#allocation19_spill] sm:$0xff] }
 0x1b1   : > { %v1999_v1 = vadd.f32 %v1892_v16, %v1778_v40  ;;  %v1565_v9 = vadd.f32 %v3591_v54, %v1344_v35  ;;  %v2001_v11 = vadd.f32 %v1896_v25, %v1780_v51  ;;  %v1566_v16 = vadd.f32 %v3592_v15, %v1345_v41  ;;  %v2273_v32 = vpop.permute.xlu0 %2272  ;;  %v3598_v35 = vld [vmem:[#allocation20_spill] sm:$0xff] }
 0x1b2   : > { %v1898_v36 = vpop.f32.mrf.mxu1  ;;  %v3435_v37 = vpop.f32.mrf.mxu0  ;;  %v1781_v18 = vadd.f32 %v3593_v3, %v1560_v13  ;;  %v1783_v20 = vadd.f32 %v3594_v19, %v1562_v61  ;;  %v1782_v22 = vadd.f32 %v3595_v21, %v1561_v50  ;;  %v1784_v28 = vadd.f32 %v3596_v27, %v1563_v47 }
 0x1b3   : > { %v1779_v34 = vadd.f32 %v3597_v33, %v1558_v55  ;;  %v1786_v38 = vadd.f32 %v3598_v35, %v1565_v9  ;;  %v1787_v63 = vadd.f32 %v3391_v7, %v1566_v16  ;;  %v1785_v53 = vadd.f32 %v3393_v52, %v1564_v57 }
 0x1b4   : > { %v1902_v56 = vpop.f32.mrf.mxu1  ;;  %v2111_v59 = vpop.f32.mrf.mxu0  ;;  %v2003_v39 = vadd.f32 %v3404_v8, %v1782_v22  ;;  %v2002_v40 = vadd.f32 %v1898_v36, %v1781_v18 }
 0x1b5   : > { %v2219_v4 = vadd.f32 %v2111_v59, %v1998_v48  ;;  %v2004_v42 = vadd.f32 %v1902_v56, %v1783_v20  ;;  %v3599_v59 = vld [vmem:[#allocation21_spill] sm:$0xff]  ;;  %v2277_v8 = vpop.permute.xlu1 %2276 }
 0x1b6   : > { %v1904_v5 = vpop.f32.mrf.mxu1  ;;  %v2113_v6 = vpop.f32.mrf.mxu0  ;;  %v1788_v60 = vadd.f32 %v3599_v59, %v1567_v45  ;;  %v2000_v45 = vadd.f32 %v3416_v17, %v1779_v34 }
 0x1b7   : > { %v2255_v58 = vmul.f32 %v3410_v14, %v2219_v4  ;;  %v2220_v12 = vadd.f32 %v2113_v6, %v1999_v1  ;;  %v2005_v51 = vadd.f32 %v1904_v5, %v1784_v28 }
 0x1b8   : > { %v1908_v23 = vpop.f32.mrf.mxu1  ;;  %v2117_v24 = vpop.f32.mrf.mxu0  ;;  %v2009_v9 = vadd.f32 %v3425_v26, %v1788_v60 }
 0x1b9   : > { %v2256_v29 = vmul.f32 %v3410_v14, %v2220_v12  ;;  %v2283_v25 = vadd.f32 %v3458_v62, %v2255_v58  ;;  %v2222_v30 = vadd.f32 %v2117_v24, %v2001_v11  ;;  %v2007_v46 = vadd.f32 %v1908_v23, %v1786_v38  ;;  %v2281_v28 = vpop.permute.xlu1 %2280 }
 0x1ba   : > { %v1910_v48 = vpop.f32.mrf.mxu1  ;;  %v2119_v41 = vpop.f32.mrf.mxu0  ;;  %v2006_v11 = vadd.f32 %v3435_v37, %v1785_v53 }
 0x1bb   : > { %v2284_v43 = vadd.f32 %v3458_v62, %v2256_v29  ;;  %v2295_v50 = vmax.f32 %v2283_v25, 0.0  ;;  %v2258_v44 = vmul.f32 %v3398_v0, %v2222_v30  ;;  %v2223_v55 = vadd.f32 %v2119_v41, %v2002_v40 }
 0x1bc   : > { %v2123_v1 = vpop.f32.mrf.mxu0  ;;  %v2688_v4 = vpop.f32.mrf.mxu1  ;;  %v2008_v18 = vadd.f32 %v1910_v48, %v1787_v63 }
 0x1bd   : > { %v2296_v10 = vmax.f32 %v2284_v43, 0.0  ;;  %2307 = vst [vmem:[%s3475_s6] sm:$0xff] %v2295_v50  ;;  %v2225_v36 = vadd.f32 %v2123_v1, %v2004_v42  ;;  %v2224_v56 = vadd.f32 %v2688_v4, %v2003_v39  ;;  %v2286_v13 = vadd.f32 %v2273_v32, %v2258_v44 }
 0x1be   : > { %v2259_v7 = vmul.f32 %v3398_v0, %v2223_v55  ;;  %v2125_v61 = vpop.f32.mrf.mxu0  ;;  %v2200_v2 = vpop.f32.mrf.mxu1 }
 0x1bf   : > { %2308 = vst [vmem:[%s3475_s6 + $0x8] sm:$0xff] %v2296_v10  ;;  %v2261_v47 = vmul.f32 %v3429_v31, %v2225_v36  ;;  %v2260_v5 = vmul.f32 %v3398_v0, %v2224_v56  ;;  %v2298_v6 = vmax.f32 %v2286_v13, 0.0  ;;  %v2226_v54 = vadd.f32 %v2125_v61, %v2005_v51 }
 0x1c0   : > { %v2287_v52 = vadd.f32 %v2273_v32, %v2259_v7  ;;  %v2221_v57 = vadd.f32 %v2200_v2, %v2000_v45  ;;  %v2129_v17 = vpop.f32.mrf.mxu0  ;;  %v2691_v58 = vpop.f32.mrf.mxu1 }
 0x1c1   : > { %v2289_v12 = vadd.f32 %v2277_v8, %v2261_v47  ;;  %v2288_v15 = vadd.f32 %v2273_v32, %v2260_v5  ;;  %2310 = vst [vmem:[%s3475_s6 + $0x18] sm:$0xff] %v2298_v6  ;;  %v2262_v16 = vmul.f32 %v3429_v31, %v2226_v54  ;;  %v2228_v3 = vadd.f32 %v2129_v17, %v2007_v46 }
 0x1c2   : > { %v2299_v0 = vmax.f32 %v2287_v52, 0.0  ;;  %v2257_v19 = vmul.f32 %v3410_v14, %v2221_v57  ;;  %v2230_v26 = vadd.f32 %v2691_v58, %v2009_v9  ;;  %v2131_v20 = vpop.f32.mrf.mxu0  ;;  %v2210_v37 = vpop.f32.mrf.mxu1 }
 0x1c3   : > { %v2301_v21 = vmax.f32 %v2289_v12, 0.0  ;;  %v2300_v22 = vmax.f32 %v2288_v15, 0.0  ;;  %v2290_v23 = vadd.f32 %v2277_v8, %v2262_v16  ;;  %v2264_v24 = vmul.f32 %v3440_v49, %v2228_v3 }
 0x1c4   : > { %2311 = vst [vmem:[%s3475_s6 + $0x20] sm:$0xff] %v2299_v0  ;;  %v2285_v27 = vadd.f32 %v3458_v62, %v2257_v19  ;;  %v2266_v29 = vmul.f32 %v3440_v49, %v2230_v26  ;;  %v2229_v25 = vadd.f32 %v2131_v20, %v2008_v18  ;;  %v2227_v14 = vadd.f32 %v2210_v37, %v2006_v11 }
 0x1c5   : > { %2313 = vst [vmem:[%s3475_s6 + $0x30] sm:$0xff] %v2301_v21  ;;  %2312 = vst [vmem:[%s3475_s6 + $0x28] sm:$0xff] %v2300_v22  ;;  %v2302_v30 = vmax.f32 %v2290_v23, 0.0  ;;  %v2292_v32 = vadd.f32 %v2281_v28, %v2264_v24 }
 0x1c6   : > { %v2297_v33 = vmax.f32 %v2285_v27, 0.0  ;;  %v2294_v34 = vadd.f32 %v2281_v28, %v2266_v29  ;;  %v2265_v35 = vmul.f32 %v3440_v49, %v2229_v25  ;;  %v2263_v62 = vmul.f32 %v3429_v31, %v2227_v14 }
 0x1c7   : > { %2314 = vst [vmem:[%s3475_s6 + $0x38] sm:$0xff] %v2302_v30  ;;  %v2304_v38 = vmax.f32 %v2292_v32, 0.0 }
 0x1c8   : > { %2309 = vst [vmem:[%s3475_s6 + $0x10] sm:$0xff] %v2297_v33  ;;  %v2306_v39 = vmax.f32 %v2294_v34, 0.0  ;;  %v2293_v40 = vadd.f32 %v2281_v28, %v2265_v35  ;;  %v2291_v48 = vadd.f32 %v2277_v8, %v2263_v62 }
 0x1c9   : > { %2316 = vst [vmem:[%s3475_s6 + $0x48] sm:$0xff] %v2304_v38 }
 0x1ca   : > { %2318 = vst [vmem:[%s3475_s6 + $0x58] sm:$0xff] %v2306_v39  ;;  %v2305_v31 = vmax.f32 %v2293_v40, 0.0  ;;  %v2303_v49 = vmax.f32 %v2291_v48, 0.0 }
 0x1cc   : > { %2317 = vst [vmem:[%s3475_s6 + $0x50] sm:$0xff] %v2305_v31  ;;  %2315 = vst [vmem:[%s3475_s6 + $0x40] sm:$0xff] %v2303_v49 }
 0x1cd   : > { %2785 = shalt.err (!%p2782_p5)
}
 0x1ce   : > { %s2786_s22 = scalar_lea.hbm %s3505_s10, 1536  ;;  %s2790_s29 = scalar_lea.hbm %s3563_s4, 3072 }
 0x1cf   : > { %p2787_p6 = scmp.ne.s32.totalorder %s3505_s10, %s2786_s22  ;;  %p2791_p10 = scmp.lt.s32.totalorder %s3505_s10, %s3563_s4 }
 0x1d0   : > { %p2792_p11 = scmp.lt.s32.totalorder %s2790_s29, %s2786_s22 }
 0x1d1   : > { %p2788_p7 = pnand %p2787_p6, %p2929_p4 }
 0x1d2   : > { %p2793_p12 = por %p2792_p11, %p2791_p10 }
 0x1d3   : > { %p2789_p9 = pneg %p2788_p7 }
 0x1d5   : > { %p2794_p13 = pnand %p2793_p12, %p2789_p9 }
 0x1d7   : > { %2797 = shalt.err (!%p2794_p13)
}
 0x1d8   : > { %s2862_s6 = smov 384   ;;  %s2863_s7 = smov 24  }
 0x1d9   : > { %2698 = dma.vmem_to_hbm [thread:$0]  (%p2929_p4), %s3507_s8, 1536, %s3505_s10, %s3514_s11, %s2862_s6, %s2862_s6, %s2863_s7  }
 0x1da PF: > { %p2705_p0 = scmp.ge.s32.totalorder %s2848_s20, 2  ;;  %s2350_s9 = sand.u32 1, %s2828_s15  }
 0x1db   : > { %s2351_s18 = scalar_lea.sflag [#allocation3], %s2350_s9 }
 0x1dc   : > { %p2701_p1 = pnand %p2705_p0, %p2936_p8 }
 0x1de   : > { %p2702_p2 = pneg %p2701_p1 }
 0x1e0   : > { %2823 = dma.done.wait (%p2702_p2), %s2351_s18, 1536  }
 0x1e1   : > { %2825 = vsyncadd (%p2702_p2), %s2351_s18, 4294965760  ;;  %s17_s20 = sadd.s32 1, %s2848_s20   ;;  %s3600_s15 = smov %s2832_s16 }
 0x1e2   : > { %p14_p3 = scmp.ge.s32.totalorder %s17_s20, 4   ;;  %s3601_s16 = smov %s2836_s17 }
 0x1e3   : > { %s3602_s17 = smov %s2942_s28  ;;  %s3603_s18 = smov %s2844_s19 }
 0x1e4   : > { %s3604_s19 = smov %s3606_s23  ;;  %16 = sbr.rel (!%p14_p3) target bundleno = 4 (0x4), region = 82 }
 0x1e9   :  { %2356 = vsyncpa [#allocation3], 1 }
 0x1ea   :  { %2358 = vsyncpa [#allocation3 + $0x1], 1 }

</bundles_post_ra>
